<compile_context>
chip_gen: v7x
topology: tpu7x:2x2x1
jax: 0.10.0
libtpu: 0.0.40
codegen_flags: <defaults>
</compile_context>

<pallas_src>
import functools
import math

import jax
import jax.numpy as jnp
from jax.experimental import pallas as pl
from jax.experimental.pallas import tpu as pltpu

LOG_STD_MAX = 2.0
LOG_STD_MIN = -20.0
_HALF_LOG_2PI = 0.5 * math.log(2.0 * math.pi)
_LOG_2 = math.log(2.0)


def _softplus(x):
    # numerically stable softplus, matches F.softplus
    return jnp.maximum(x, 0.0) + jnp.log1p(jnp.exp(-jnp.abs(x)))


def _actor_body(obs_ref, w1_ref, b1_ref, w2_ref, b2_ref, wh_ref, bh_ref,
                eps_ref, out_ref, *, act_limit, act_dim):
    x = obs_ref[...]  # bf16 tile (tile_b, obs_dim)

    # trunk: Linear -> ReLU -> Linear -> ReLU   (bf16 MXU, f32 accumulate)
    h1 = jnp.dot(x, w1_ref[...], preferred_element_type=jnp.float32) + b1_ref[...]
    h1 = jnp.maximum(h1, 0.0)
    h2 = jnp.dot(h1.astype(jnp.bfloat16), w2_ref[...],
                 preferred_element_type=jnp.float32) + b2_ref[...]
    h2 = jnp.maximum(h2, 0.0)

    # fused mu / log_std heads: single matmul, split columns in-register
    heads = jnp.dot(h2.astype(jnp.bfloat16), wh_ref[...],
                    preferred_element_type=jnp.float32) + bh_ref[...]
    mu = heads[:, :act_dim]
    log_std = jnp.clip(heads[:, act_dim:], LOG_STD_MIN, LOG_STD_MAX)
    std = jnp.exp(log_std)

    if eps_ref is None:
        pi_action = mu
        z = jnp.zeros_like(mu)          # (pi - mu) / std == 0 exactly
    else:
        eps = eps_ref[...]
        pi_action = mu + std * eps      # rsample
        z = eps                         # (pi - mu) / std == eps exactly (no divide)

    # Normal log-prob + tanh-squash correction, merged into ONE lane reduction
    log_prob = -0.5 * z * z - log_std - _HALF_LOG_2PI
    corr = 2.0 * (_LOG_2 - pi_action - _softplus(-2.0 * pi_action))
    logp_pi = jnp.sum(log_prob - corr, axis=-1, keepdims=True)

    act = act_limit * jnp.tanh(pi_action)

    # single output slab: columns [0, act_dim) = action, column act_dim = logp
    out_ref[:, :act_dim] = act.astype(out_ref.dtype)
    out_ref[:, act_dim:] = logp_pi.astype(out_ref.dtype)


def _stoch_kernel(obs_ref, w1, b1, w2, b2, wh, bh, eps_ref, out_ref, *,
                  act_limit, act_dim):
    _actor_body(obs_ref, w1, b1, w2, b2, wh, bh, eps_ref, out_ref,
                act_limit=act_limit, act_dim=act_dim)


def _det_kernel(obs_ref, w1, b1, w2, b2, wh, bh, out_ref, *,
                act_limit, act_dim):
    _actor_body(obs_ref, w1, b1, w2, b2, wh, bh, None, out_ref,
                act_limit=act_limit, act_dim=act_dim)


def squashed_gaussian_actor(obs, params, eps=None, *, act_limit=1.0,
                            deterministic=False, tile_b=1024):
    """SAC actor forward pass.  Returns (pi_action (B, act_dim), logp_pi (B,))."""
    w1, b1, w2, b2, wmu, bmu, wls, bls = params
    B, obs_dim = obs.shape
    act_dim = wmu.shape[1]
    h1d = w1.shape[1]
    h2d = w2.shape[1]

    # fuse the two heads (ideally done once outside the step; cheap either way)
    wh = jnp.concatenate([wmu, wls], axis=1).astype(jnp.bfloat16)
    bh = jnp.concatenate([bmu, bls], axis=1).astype(jnp.float32)
    w1b = w1.astype(jnp.bfloat16)
    w2b = w2.astype(jnp.bfloat16)

    # batch tiling: tile_b rows per grid step; weights VMEM-resident across steps
    tile_b = max(8, min(int(tile_b), B))
    tile_b = (tile_b // 8) * 8
    n_blocks = -(-B // tile_b)
    Bp = n_blocks * tile_b

    obs_b = obs.astype(jnp.bfloat16)
    if Bp != B:
        obs_b = jnp.pad(obs_b, ((0, Bp - B), (0, 0)))

    def const_spec(shape):
        return pl.BlockSpec(shape, lambda i: (0, 0))

    in_specs = [
        pl.BlockSpec((tile_b, obs_dim), lambda i: (i, 0)),   # obs tile
        const_spec((obs_dim, h1d)), const_spec((1, h1d)),     # w1, b1
        const_spec((h1d, h2d)), const_spec((1, h2d)),         # w2, b2
        const_spec((h2d, 2 * act_dim)), const_spec((1, 2 * act_dim)),  # fused heads
    ]
    inputs = [obs_b, w1b, b1, w2b, b2, wh, bh]

    if deterministic:
        kernel = functools.partial(_det_kernel, act_limit=float(act_limit),
                                   act_dim=act_dim)
    else:
        assert eps is not None, "stochastic path needs reparameterization noise"
        eps_f = eps.astype(jnp.float32)
        if Bp != B:
            eps_f = jnp.pad(eps_f, ((0, Bp - B), (0, 0)))
        in_specs.append(pl.BlockSpec((tile_b, act_dim), lambda i: (i, 0)))
        inputs.append(eps_f)
        kernel = functools.partial(_stoch_kernel, act_limit=float(act_limit),
                                   act_dim=act_dim)

    out = pl.pallas_call(
        kernel,
        out_shape=jax.ShapeDtypeStruct((Bp, act_dim + 1), jnp.float32),
        grid=(n_blocks,),
        in_specs=in_specs,
        out_specs=pl.BlockSpec((tile_b, act_dim + 1), lambda i: (i, 0)),
        compiler_params=pltpu.CompilerParams(
            dimension_semantics=("parallel",),          # v7x: shard batch tiles over 2 TCs
            vmem_limit_bytes=32 * 1024 * 1024),         # fits v7x's 64 MiB physical VMEM
    )(*inputs)

    return out[:B, :act_dim], out[:B, act_dim]


def actor_reference(obs, params, eps, *, act_limit=1.0, deterministic=False):
    """Pure-JAX reference with matching bf16 matmul behaviour."""
    w1, b1, w2, b2, wmu, bmu, wls, bls = params
    bf = jnp.bfloat16
    x = obs.astype(bf)
    h1 = jnp.maximum(
        jnp.dot(x, w1.astype(bf), preferred_element_type=jnp.float32) + b1, 0.0)
    h2 = jnp.maximum(
        jnp.dot(h1.astype(bf), w2.astype(bf), preferred_element_type=jnp.float32) + b2, 0.0)
    mu = jnp.dot(h2.astype(bf), wmu.astype(bf), preferred_element_type=jnp.float32) + bmu
    log_std = jnp.clip(
        jnp.dot(h2.astype(bf), wls.astype(bf), preferred_element_type=jnp.float32) + bls,
        LOG_STD_MIN, LOG_STD_MAX)
    std = jnp.exp(log_std)
    if deterministic:
        pi = mu
        z = jnp.zeros_like(mu)
    else:
        pi = mu + std * eps
        z = (pi - mu) / std
    logp = jnp.sum(-0.5 * z * z - log_std - _HALF_LOG_2PI, axis=-1)
    logp = logp - jnp.sum(2.0 * (_LOG_2 - pi - _softplus(-2.0 * pi)), axis=-1)
    return act_limit * jnp.tanh(pi), logp


def init_linear(key, fan_in, fan_out):
    # PyTorch nn.Linear default init: U(-1/sqrt(fan_in), 1/sqrt(fan_in))
    kw, kb = jax.random.split(key)
    bound = 1.0 / jnp.sqrt(fan_in)
    w = jax.random.uniform(kw, (fan_in, fan_out), jnp.float32, -bound, bound)
    b = jax.random.uniform(kb, (1, fan_out), jnp.float32, -bound, bound)
    return w, b


if __name__ == "__main__":
    # Small, module-consistent shapes (grid of 2 batch tiles to exercise pipelining)
    batch = 64
    obs_dim = 16
    hidden_sizes = (32, 32)
    act_dim = 4
    act_limit = 1.0

    root = jax.random.PRNGKey(0)
    k_obs, k_eps, k1, k2, k3, k4 = jax.random.split(root, 6)

    obs = jax.random.normal(k_obs, (batch, obs_dim), jnp.float32)
    eps = jax.random.normal(k_eps, (batch, act_dim), jnp.float32)  # reparameterization noise

    w1, b1 = init_linear(k1, obs_dim, hidden_sizes[0])
    w2, b2 = init_linear(k2, hidden_sizes[0], hidden_sizes[1])
    wmu, bmu = init_linear(k3, hidden_sizes[1], act_dim)
    wls, bls = init_linear(k4, hidden_sizes[1], act_dim)
    params = (w1, b1, w2, b2, wmu, bmu, wls, bls)

    # stochastic path
    pi_action, logp_pi = squashed_gaussian_actor(
        obs, params, eps, act_limit=act_limit, deterministic=False, tile_b=32)
    # deterministic path (no eps input at all)
    pi_det, logp_det = squashed_gaussian_actor(
        obs, params, act_limit=act_limit, deterministic=True, tile_b=32)
    jax.block_until_ready((pi_action, logp_pi, pi_det, logp_det))

    assert pi_action.shape == (batch, act_dim)
    assert logp_pi.shape == (batch,)

    ref_a, ref_l = actor_reference(obs, params, eps, act_limit=act_limit, deterministic=False)
    ref_ad, ref_ld = actor_reference(obs, params, eps, act_limit=act_limit, deterministic=True)

    assert jnp.allclose(pi_action, ref_a, atol=1e-2, rtol=1e-2)
    assert jnp.allclose(logp_pi, ref_l, atol=2e-2, rtol=2e-2)
    assert jnp.allclose(pi_det, ref_ad, atol=1e-2, rtol=1e-2)
    assert jnp.allclose(logp_det, ref_ld, atol=2e-2, rtol=2e-2)

    print("KERNEL_OK")
</pallas_src>

<mosaic_0001>
module attributes {stable_mosaic.version = 11 : i64} {
  func.func @_stoch_kernel(%arg0: i32, %arg1: memref<32x16xbf16, #tpu.memory_space<vmem>>, %arg2: memref<16x32xbf16, #tpu.memory_space<vmem>>, %arg3: memref<1x32xf32, #tpu.memory_space<vmem>>, %arg4: memref<32x32xbf16, #tpu.memory_space<vmem>>, %arg5: memref<1x32xf32, #tpu.memory_space<vmem>>, %arg6: memref<32x8xbf16, #tpu.memory_space<vmem>>, %arg7: memref<1x8xf32, #tpu.memory_space<vmem>>, %arg8: memref<32x4xf32, #tpu.memory_space<vmem>>, %arg9: memref<32x5xf32, #tpu.memory_space<vmem>>) attributes {dimension_semantics = [#tpu.dimension_semantics<parallel>], iteration_bounds = array<i64: 2>, scalar_prefetch = 0 : i64, scratch_operands = 0 : i64, tpu.core_type = #tpu.core_type<tc>, window_params = [{transform_indices = @transform_0, window_bounds = array<i64: 32, 16>}, {pipeline_mode = #tpu.pipeline_mode<synchronous>, transform_indices = @transform_1, window_bounds = array<i64: 16, 32>}, {pipeline_mode = #tpu.pipeline_mode<synchronous>, transform_indices = @transform_2, window_bounds = array<i64: 1, 32>}, {pipeline_mode = #tpu.pipeline_mode<synchronous>, transform_indices = @transform_3, window_bounds = array<i64: 32, 32>}, {pipeline_mode = #tpu.pipeline_mode<synchronous>, transform_indices = @transform_4, window_bounds = array<i64: 1, 32>}, {pipeline_mode = #tpu.pipeline_mode<synchronous>, transform_indices = @transform_5, window_bounds = array<i64: 32, 8>}, {pipeline_mode = #tpu.pipeline_mode<synchronous>, transform_indices = @transform_6, window_bounds = array<i64: 1, 8>}, {transform_indices = @transform_7, window_bounds = array<i64: 32, 4>}, {transform_indices = @transform_8, window_bounds = array<i64: 32, 5>}]} {
    %c0 = arith.constant 0 : index
    %c0_0 = arith.constant 0 : index
    %0 = vector.load %arg1[%c0, %c0_0] : memref<32x16xbf16, #tpu.memory_space<vmem>>, vector<32x16xbf16>
    %c0_1 = arith.constant 0 : index
    %c0_2 = arith.constant 0 : index
    %1 = vector.load %arg2[%c0_1, %c0_2] : memref<16x32xbf16, #tpu.memory_space<vmem>>, vector<16x32xbf16>
    %cst = arith.constant dense<0.000000e+00> : vector<32x32xf32>
    %2 = tpu.matmul %0, %1, %cst {dimension_numbers = #tpu.dot_dimension_numbers<[1], [0], [0], [1], [0, 0, 1, 1], [], []>} : vector<32x16xbf16>, vector<16x32xbf16>, vector<32x32xf32> -> vector<32x32xf32>
    %c0_3 = arith.constant 0 : index
    %c0_4 = arith.constant 0 : index
    %3 = vector.load %arg3[%c0_3, %c0_4] : memref<1x32xf32, #tpu.memory_space<vmem>>, vector<1x32xf32>
    %4 = vector.broadcast %3 : vector<1x32xf32> to vector<32x32xf32>
    %5 = arith.addf %2, %4 : vector<32x32xf32>
    %cst_5 = arith.constant 0.000000e+00 : f32
    %6 = vector.broadcast %cst_5 : f32 to vector<32x32xf32>
    %7 = arith.maximumf %5, %6 : vector<32x32xf32>
    %8 = arith.truncf %7 : vector<32x32xf32> to vector<32x32xbf16>
    %c0_6 = arith.constant 0 : index
    %c0_7 = arith.constant 0 : index
    %9 = vector.load %arg4[%c0_6, %c0_7] : memref<32x32xbf16, #tpu.memory_space<vmem>>, vector<32x32xbf16>
    %cst_8 = arith.constant dense<0.000000e+00> : vector<32x32xf32>
    %10 = tpu.matmul %8, %9, %cst_8 {dimension_numbers = #tpu.dot_dimension_numbers<[1], [0], [0], [1], [0, 0, 1, 1], [], []>} : vector<32x32xbf16>, vector<32x32xbf16>, vector<32x32xf32> -> vector<32x32xf32>
    %c0_9 = arith.constant 0 : index
    %c0_10 = arith.constant 0 : index
    %11 = vector.load %arg5[%c0_9, %c0_10] : memref<1x32xf32, #tpu.memory_space<vmem>>, vector<1x32xf32>
    %12 = vector.broadcast %11 : vector<1x32xf32> to vector<32x32xf32>
    %13 = arith.addf %10, %12 : vector<32x32xf32>
    %cst_11 = arith.constant 0.000000e+00 : f32
    %14 = vector.broadcast %cst_11 : f32 to vector<32x32xf32>
    %15 = arith.maximumf %13, %14 : vector<32x32xf32>
    %16 = arith.truncf %15 : vector<32x32xf32> to vector<32x32xbf16>
    %c0_12 = arith.constant 0 : index
    %c0_13 = arith.constant 0 : index
    %17 = vector.load %arg6[%c0_12, %c0_13] : memref<32x8xbf16, #tpu.memory_space<vmem>>, vector<32x8xbf16>
    %cst_14 = arith.constant dense<0.000000e+00> : vector<32x8xf32>
    %18 = tpu.matmul %16, %17, %cst_14 {dimension_numbers = #tpu.dot_dimension_numbers<[1], [0], [0], [1], [0, 0, 1, 1], [], []>} : vector<32x32xbf16>, vector<32x8xbf16>, vector<32x8xf32> -> vector<32x8xf32>
    %c0_15 = arith.constant 0 : index
    %c0_16 = arith.constant 0 : index
    %19 = vector.load %arg7[%c0_15, %c0_16] : memref<1x8xf32, #tpu.memory_space<vmem>>, vector<1x8xf32>
    %20 = vector.broadcast %19 : vector<1x8xf32> to vector<32x8xf32>
    %21 = arith.addf %18, %20 : vector<32x8xf32>
    %22 = vector.extract_strided_slice %21 {offsets = [0, 0], sizes = [32, 4], strides = [1, 1]} : vector<32x8xf32> to vector<32x4xf32>
    %23 = vector.extract_strided_slice %21 {offsets = [0, 4], sizes = [32, 4], strides = [1, 1]} : vector<32x8xf32> to vector<32x4xf32>
    %cst_17 = arith.constant -2.000000e+01 : f32
    %cst_18 = arith.constant 2.000000e+00 : f32
    %24 = vector.broadcast %cst_17 : f32 to vector<32x4xf32>
    %25 = arith.maximumf %24, %23 : vector<32x4xf32>
    %26 = vector.broadcast %cst_18 : f32 to vector<32x4xf32>
    %27 = arith.minimumf %26, %25 : vector<32x4xf32>
    %28 = math.exp %27 : vector<32x4xf32>
    %c0_19 = arith.constant 0 : index
    %c0_20 = arith.constant 0 : index
    %29 = vector.load %arg8[%c0_19, %c0_20] : memref<32x4xf32, #tpu.memory_space<vmem>>, vector<32x4xf32>
    %30 = arith.mulf %28, %29 : vector<32x4xf32>
    %31 = arith.addf %22, %30 : vector<32x4xf32>
    %cst_21 = arith.constant -5.000000e-01 : f32
    %32 = vector.broadcast %cst_21 : f32 to vector<32x4xf32>
    %33 = arith.mulf %32, %29 : vector<32x4xf32>
    %34 = arith.mulf %33, %29 : vector<32x4xf32>
    %35 = arith.subf %34, %27 : vector<32x4xf32>
    %cst_22 = arith.constant 0.918938517 : f32
    %36 = vector.broadcast %cst_22 : f32 to vector<32x4xf32>
    %37 = arith.subf %35, %36 : vector<32x4xf32>
    %cst_23 = arith.constant 0.693147182 : f32
    %38 = vector.broadcast %cst_23 : f32 to vector<32x4xf32>
    %39 = arith.subf %38, %31 : vector<32x4xf32>
    %cst_24 = arith.constant -2.000000e+00 : f32
    %40 = vector.broadcast %cst_24 : f32 to vector<32x4xf32>
    %41 = arith.mulf %40, %31 : vector<32x4xf32>
    %cst_25 = arith.constant 0.000000e+00 : f32
    %42 = vector.broadcast %cst_25 : f32 to vector<32x4xf32>
    %43 = arith.maximumf %41, %42 : vector<32x4xf32>
    %44 = math.absf %41 : vector<32x4xf32>
    %cst_26 = arith.constant 0.000000e+00 : f32
    %45 = vector.broadcast %cst_26 : f32 to vector<32x4xf32>
    %46 = arith.subf %45, %44 : vector<32x4xf32>
    %47 = math.exp %46 : vector<32x4xf32>
    %48 = math.log1p %47 : vector<32x4xf32>
    %49 = arith.addf %43, %48 : vector<32x4xf32>
    %50 = arith.subf %39, %49 : vector<32x4xf32>
    %cst_27 = arith.constant 2.000000e+00 : f32
    %51 = vector.broadcast %cst_27 : f32 to vector<32x4xf32>
    %52 = arith.mulf %51, %50 : vector<32x4xf32>
    %53 = arith.subf %37, %52 : vector<32x4xf32>
    %cst_28 = arith.constant dense<0.000000e+00> : vector<32xf32>
    %54 = vector.multi_reduction <add>, %53, %cst_28 [1] : vector<32x4xf32> to vector<32xf32>
    %55 = vector.shape_cast %54 : vector<32xf32> to vector<32x1xf32>
    %56 = math.tanh %31 : vector<32x4xf32>
    %cst_29 = arith.constant 1.000000e+00 : f32
    %57 = vector.broadcast %cst_29 : f32 to vector<32x4xf32>
    %58 = arith.mulf %57, %56 : vector<32x4xf32>
    %c0_30 = arith.constant 0 : index
    %c0_31 = arith.constant 0 : index
    %59 = vector.load %arg9[%c0_30, %c0_31] : memref<32x5xf32, #tpu.memory_space<vmem>>, vector<32x4xf32>
    tpu.vector_store %arg9[%c0_30, %c0_31], %58 {strides = array<i32>} : memref<32x5xf32, #tpu.memory_space<vmem>>, vector<32x4xf32>,
    %c0_32 = arith.constant 0 : index
    %c4 = arith.constant 4 : index
    %60 = vector.load %arg9[%c0_32, %c4] : memref<32x5xf32, #tpu.memory_space<vmem>>, vector<32x1xf32>
    tpu.vector_store %arg9[%c0_32, %c4], %55 {strides = array<i32>} : memref<32x5xf32, #tpu.memory_space<vmem>>, vector<32x1xf32>,
    return
  }
  func.func @transform_0(%arg0: i32) -> (i32, i32) {
    %c0_i32 = arith.constant 0 : i32
    %c0_i32_0 = arith.constant 0 : i32
    return %arg0, %c0_i32 : i32, i32
  }
  func.func @transform_1(%arg0: i32) -> (i32, i32) {
    %c0_i32 = arith.constant 0 : i32
    %c0_i32_0 = arith.constant 0 : i32
    %c0_i32_1 = arith.constant 0 : i32
    return %c0_i32, %c0_i32_0 : i32, i32
  }
  func.func @transform_2(%arg0: i32) -> (i32, i32) {
    %c0_i32 = arith.constant 0 : i32
    %c0_i32_0 = arith.constant 0 : i32
    %c0_i32_1 = arith.constant 0 : i32
    return %c0_i32, %c0_i32_0 : i32, i32
  }
  func.func @transform_3(%arg0: i32) -> (i32, i32) {
    %c0_i32 = arith.constant 0 : i32
    %c0_i32_0 = arith.constant 0 : i32
    %c0_i32_1 = arith.constant 0 : i32
    return %c0_i32, %c0_i32_0 : i32, i32
  }
  func.func @transform_4(%arg0: i32) -> (i32, i32) {
    %c0_i32 = arith.constant 0 : i32
    %c0_i32_0 = arith.constant 0 : i32
    %c0_i32_1 = arith.constant 0 : i32
    return %c0_i32, %c0_i32_0 : i32, i32
  }
  func.func @transform_5(%arg0: i32) -> (i32, i32) {
    %c0_i32 = arith.constant 0 : i32
    %c0_i32_0 = arith.constant 0 : i32
    %c0_i32_1 = arith.constant 0 : i32
    return %c0_i32, %c0_i32_0 : i32, i32
  }
  func.func @transform_6(%arg0: i32) -> (i32, i32) {
    %c0_i32 = arith.constant 0 : i32
    %c0_i32_0 = arith.constant 0 : i32
    %c0_i32_1 = arith.constant 0 : i32
    return %c0_i32, %c0_i32_0 : i32, i32
  }
  func.func @transform_7(%arg0: i32) -> (i32, i32) {
    %c0_i32 = arith.constant 0 : i32
    %c0_i32_0 = arith.constant 0 : i32
    return %arg0, %c0_i32 : i32, i32
  }
  func.func @transform_8(%arg0: i32) -> (i32, i32) {
    %c0_i32 = arith.constant 0 : i32
    %c0_i32_0 = arith.constant 0 : i32
    return %arg0, %c0_i32 : i32, i32
  }
}

</mosaic_0001>

<bundles_post_ra>
// kernel: tpu_custom_call.1
= control target key start
LH: loop header
LB: loop body
LE: loop exit
PB: predicated region body
PF: predicated region fallthrough
CT: control target
= control target key end

     0   :  { %s1022_s27 = smov 0   ;;  %s1158_s0 = inlined_call_operand.vmem [shape: bf16[64,16], index: 0, kind: input, shape index: {}]   ;;  %s1159_s1 = inlined_call_operand.vmem [shape: bf16[16,32], index: 1, kind: input, shape index: {}]   ;;  %s1160_s2 = inlined_call_operand.vmem [shape: f32[1,32], index: 2, kind: input, shape index: {}]   ;;  %s1161_s3 = inlined_call_operand.vmem [shape: bf16[32,32], index: 3, kind: input, shape index: {}]   ;;  %s1162_s4 = inlined_call_operand.vmem [shape: f32[1,32], index: 4, kind: input, shape index: {}]   ;;  %s1163_s5 = inlined_call_operand.vmem [shape: bf16[32,8], index: 5, kind: input, shape index: {}]   ;;  %s1164_s6 = inlined_call_operand.vmem [shape: f32[1,8], index: 6, kind: input, shape index: {}]   ;;  %s1165_s7 = inlined_call_operand.vmem [shape: f32[64,4], index: 7, kind: input, shape index: {}]   ;;  %s1166_s8 = inlined_call_operand.vmem [shape: f32[64,5], index: 8, kind: output, shape index: {}]  }
   0x1 LB: > { %s852_s28 = sadd.s32 4294967295, %s973_s27   ;;  %p856_p0 = scmp.ge.s32.totalorder %s973_s27, 1  ;;  %s973_s27 = sphi %s1022_s27, %s18_s27  }
   0x2   : > { %p274_p1 = scmp.lt.s32.totalorder %s973_s27, 3 }
   0x4   : > { %p275_p2 = pnand %p856_p0, %p274_p1 }
   0x5   : > { %v928_v0 = vld [vmem:[%s1159_s1] sm:$0xff] (!%p275_p2)   ;;  %s857_s9 = sshll.u32 (!%p275_p2), %s852_s28, 2  ;;  %vm361_vm0 = vcmask (!%p275_p2), 130048   ;;  %v932_v4 = vld [vmem:[%s1161_s3 + $0x8] sm:$0xff] (!%p275_p2)   ;;  %vm446_vm1 = vcmask (!%p275_p2), 261120   ;;  %s975_s29 = smov (!%p275_p2), 4  }
   0x6   : > { %278 = sbr.rel (%p275_p2) target bundleno = 1008 (0x3f0), region = 52  ;;  %p314_p3 = scmp.lt.s32.totalorder (!%p275_p2), %s857_s9, 7  ;;  %896 = vmatprep.subr.bf16.mxu0 (!%p275_p2), %v928_v0  ;;  %v931_v3 = vld [vmem:[%s1161_s3] sm:$0xff] (!%p275_p2)   ;;  %v934_v21 = vld [vmem:[%s1163_s5 + $0x8] sm:$0xff] (!%p275_p2)   ;;  %vm758_vm2 = vcmask (!%p275_p2), 31744   ;;  %vm779_vm7 = vcmask (!%p275_p2), 39968  }
   0x7   : > { %897 = vmatpush3.bf16.msra.mxu0 (!%p275_p2), %v928_v0  ;;  %902 = vmatprep.subr.bf16.mxu1 (!%p275_p2), %v931_v3  ;;  %v863_v5 = vld [vmem:[%s1160_s2] ss:$0 sm:$0xff] (!%p275_p2) }
   0x8   : > { %903 = vmatpush3.bf16.msra.mxu1 (!%p275_p2), %v931_v3  ;;  %v933_v20 = vld [vmem:[%s1163_s5] sm:$0xff] (!%p275_p2)  }
   0x9   : > { %904 = vmatprep.subr.bf16.mxu1 (!%p275_p2), %v932_v4  ;;  %910 = vmatprep.subr.bf16.mxu0 (!%p275_p2), %v933_v20  ;;  %v869_v26 = vld [vmem:[%s1162_s4] ss:$0 sm:$0xff] (!%p275_p2) }
   0xa   : > { %v874_v41 = vld [vmem:[%s1164_s6] ss:$0 sm:$0xff] (!%p275_p2) }
   0xc   : > { %905 = vmatpush3.bf16.msra.mxu1 (!%p275_p2), %v932_v4 }
   0xd   : > { %s1168_s9 = smov (!%p314_p3, %s857_s9), 7 }
   0xe   : > { %s858_s10 = sshll.u32 %s1168_s9, 2  ;;  %s860_s24 = sshll.u32 %s1168_s9, 3 }
   0xf   : > { %s317_s13 = scalar_lea.vmem %s1158_s0, %s858_s10  ;;  %s323_s28 = scalar_lea.vmem %s1165_s7, %s860_s24 }
  0x10   : > { %v929_v1 = vld [vmem:[%s317_s13] sm:$0xff]   ;;  %v930_v2 = vld [vmem:[%s317_s13 + $0x8] sm:$0xff]   ;;  %v1062_v22 = vld [vmem:[%s323_s28 + $0x10] sm:$0xff]  ;;  %s976_s13 = smov 124   ;;  %s1114_s16 = scalar_lea.vmem %s1166_s8, %s860_s24 }
  0x11   : > { %898 = vmatprep.mubr.msk.bf16.mxu0 %vm361_vm0, %v929_v1  ;;  %v1064_v23 = vld [vmem:[%s323_s28] sm:$0xff]  ;;  %614 = vrot.lane.b32.xlu1 %v1062_v22, %s975_s29  ;;  %v1068_v24 = vld [vmem:[%s323_s28 + $0x18] sm:$0xff]  ;;  %v1070_v25 = vld [vmem:[%s323_s28 + $0x8] sm:$0xff] }
  0x12   : > { %899 = vmatmul.mubr.msk.bf16.vlgmr.msra.gmra.mrb[0].mxu0 %vm361_vm0, %v930_v2  ;;  %610 = vrot.lane.b32.xlu0 %v1064_v23, %s975_s29 }
  0x13   : > { %911 = vmatpush3.bf16.msra.mxu0 %v933_v20 }
  0x14   : > { %912 = vmatprep.subr.bf16.mxu0 %v934_v21 }
  0x15   : > { %616 = vrot.lane.b32.xlu1 %v1068_v24, %s975_s29 }
  0x16   : > { %612 = vrot.lane.b32.xlu0 %v1070_v25, %s975_s29 }
  0x17   : > { %913 = vmatpush3.bf16.msra.mxu0 %v934_v21 }
  0x83   : > { %v615_v63 = vpop.permute.xlu1 %614 }
  0x84   : > { %v611_v62 = vpop.permute.xlu0 %610 }
  0x88   : > { %v613_v1 = vpop.permute.xlu0 %612 }
  0xe5   : > { %v900_v6 = vpop.f32.mrb[0].mxu0 }
  0xe6   : > { %v411_v7 = vadd.f32 %v900_v6, %v863_v5  ;;  %v402_v8 = vpop.f32.mrb[1].mxu0 }
  0xe7   : > { %v403_v9 = vadd.f32 %v863_v5, %v402_v8  ;;  %v901_v10 = vpop.f32.mrb[2].mxu0 }
  0xe8   : > { %v414_v11 = vadd.f32 %v901_v10, %v863_v5  ;;  %v405_v12 = vpop.f32.mrb[3].mxu0  ;;  %v419_v14 = vmax.f32 %v411_v7, 0.0  ;;  %v617_v7 = vpop.permute.xlu1 %616 }
  0xe9   : > { %v406_v13 = vadd.f32 %v863_v5, %v405_v12  ;;  %v417_v16 = vmax.f32 %v403_v9, 0.0 }
  0xea   : > { %v420_v15 = vmax.f32 %v414_v11, 0.0 }
  0xeb   : > { %v418_v17 = vmax.f32 %v406_v13, 0.0 }
  0xec   : > { %v422_v18 = vpack.c.bf16 %v420_v15, %v419_v14 }
  0xed   : > { %v421_v19 = vpack.c.bf16 %v418_v17, %v417_v16 }
  0xef   : > { %906 = vmatprep.mubr.msk.bf16.mxu1 %vm446_vm1, %v421_v19 }
  0xf0   : > { %907 = vmatmul.mubr.msk.bf16.vlgmr.msra.gmra.mrb[0].mxu1 %vm446_vm1, %v422_v18 }
 0x1c3   : > { %v908_v27 = vpop.f32.mrb[0].mxu1 }
 0x1c4   : > { %v496_v28 = vadd.f32 %v908_v27, %v869_v26  ;;  %v487_v29 = vpop.f32.mrb[1].mxu1 }
 0x1c5   : > { %v488_v30 = vadd.f32 %v869_v26, %v487_v29  ;;  %v909_v31 = vpop.f32.mrb[2].mxu1 }
 0x1c6   : > { %v499_v32 = vadd.f32 %v909_v31, %v869_v26  ;;  %v490_v33 = vpop.f32.mrb[3].mxu1  ;;  %v504_v35 = vmax.f32 %v496_v28, 0.0 }
 0x1c7   : > { %v491_v34 = vadd.f32 %v869_v26, %v490_v33  ;;  %v502_v37 = vmax.f32 %v488_v30, 0.0 }
 0x1c8   : > { %v505_v36 = vmax.f32 %v499_v32, 0.0 }
 0x1c9   : > { %v503_v38 = vmax.f32 %v491_v34, 0.0 }
 0x1ca   : > { %v507_v39 = vpack.c.bf16 %v505_v36, %v504_v35 }
 0x1cb   : > { %v506_v40 = vpack.c.bf16 %v503_v38, %v502_v37 }
 0x1cd   : > { %914 = vmatprep.mubr.msk.bf16.mxu0 %vm446_vm1, %v506_v40 }
 0x1ce   : > { %915 = vmatmul.mubr.msk.bf16.vlgmr.msra.gmra.mrb[4].mxu0 %vm446_vm1, %v507_v39 }
 0x2a1   : > { %v916_v42 = vpop.f32.mrb[4].mxu0 }
 0x2a2   : > { %v580_v43 = vadd.f32 %v916_v42, %v874_v41  ;;  %v571_v44 = vpop.f32.mrb[5].mxu0 }
 0x2a3   : > { %v572_v45 = vadd.f32 %v874_v41, %v571_v44  ;;  %v917_v46 = vpop.f32.mrb[6].mxu0 }
 0x2a4   : > { %v588_v47 = vmax.f32 %v580_v43, -20.0  ;;  %v583_v48 = vadd.f32 %v917_v46, %v874_v41  ;;  %v574_v49 = vpop.f32.mrb[7].mxu0 }
 0x2a5   : > { %v586_v50 = vmax.f32 %v572_v45, -20.0  ;;  %v575_v51 = vadd.f32 %v874_v41, %v574_v49 }
 0x2a6   : > { %v592_v52 = vmin.f32 %v588_v47, 2.0  ;;  %v589_v53 = vmax.f32 %v583_v48, -20.0 }
 0x2a7   : > { %v590_v54 = vmin.f32 %v586_v50, 2.0  ;;  %v587_v55 = vmax.f32 %v575_v51, -20.0  ;;  %v646_v50 = vmul.f32 -0.5, %v1064_v23 }
 0x2a8   : > { %v598_v56 = vmul.f32 1.442695, %v592_v52  ;;  %v593_v57 = vmin.f32 %v589_v53, 2.0  ;;  %v647_v53 = vmul.f32 -0.5, %v1070_v25 }
 0x2a9   : > { %v594_v58 = vmul.f32 1.442695, %v590_v54  ;;  %v591_v59 = vmin.f32 %v587_v55, 2.0  ;;  %v649_v55 = vmul.f32 -0.5, %v1068_v24 }
 0x2aa   : > { %v600_v60 = vmul.f32 1.442695, %v593_v57 }
 0x2ab   : > { %935 = vpow2.f32 %v594_v58  ;;  %v596_v61 = vmul.f32 1.442695, %v591_v59 }
 0x2ac   : > { %937 = vpow2.f32 %v598_v56 }
 0x2ad   : > { %939 = vpow2.f32 %v596_v61  ;;  %v651_v61 = vmul.f32 %v647_v53, %v1070_v25 }
 0x2ae   : > { %941 = vpow2.f32 %v600_v60 }
 0x2b5   : > { %v936_v0 = vpop.eup %935 }
 0x2b6   : > { %v938_v2 = vpop.eup %937  ;;  %v622_v3 = vmul.f32 %v936_v0, %v611_v62 }
 0x2b7   : > { %v940_v4 = vpop.eup %939  ;;  %v624_v8 = vmul.f32 %v938_v2, %v615_v63 }
 0x2b8   : > { %v623_v5 = vmul.f32 %v940_v4, %v613_v1  ;;  %630 = vrot.lane.b32.xlu0 %v622_v3, %s976_s13  ;;  %v942_v6 = vpop.eup %941  ;;  %v653_v4 = vmul.f32 %v649_v55, %v1068_v24 }
 0x2b9   : > { %v625_v9 = vmul.f32 %v942_v6, %v617_v7 }
 0x2ba   : > { %632 = vrot.lane.b32.xlu1 %v623_v5, %s976_s13 }
 0x2bc   : > { %634 = vrot.lane.b32.xlu0 %v624_v8, %s976_s13 }
 0x2be   : > { %636 = vrot.lane.b32.xlu1 %v625_v9, %s976_s13 }
 0x2c0   : > { %658 = vrot.lane.b32.xlu0 %v590_v54, %s976_s13 }
 0x2c2   : > { %660 = vrot.lane.b32.xlu1 %v591_v59, %s976_s13 }
 0x2c4   : > { %662 = vrot.lane.b32.xlu0 %v592_v52, %s976_s13  ;;  %v648_v52 = vmul.f32 -0.5, %v1062_v22 }
 0x2c6   : > { %664 = vrot.lane.b32.xlu1 %v593_v57, %s976_s13  ;;  %v650_v57 = vmul.f32 %v646_v50, %v1064_v23  ;;  %v652_v62 = vmul.f32 %v648_v52, %v1062_v22 }
 0x32a   : > { %v631_v10 = vpop.permute.xlu0 %630 }
 0x32b   : > { %v1082_v11 = vadd.f32 %v631_v10, %v572_v45 }
 0x32c   : > { %v633_v12 = vpop.permute.xlu1 %632 }
 0x32d   : > { %v1085_v13 = vmul.f32 -2.0, %v1082_v11  ;;  %943 = vtanh.f32 %v1082_v11  ;;  %v1088_v14 = vadd.f32 %v633_v12, %v575_v51  ;;  %v678_v2 = vsub.f32 0.6931472, %v1082_v11 }
 0x32e   : > { %v635_v15 = vpop.permute.xlu0 %634 }
 0x32f   : > { %v690_v16 = vand.u32 2147483647, %v1085_v13  ;;  %v1092_v17 = vmul.f32 -2.0, %v1088_v14  ;;  %945 = vtanh.f32 %v1088_v14  ;;  %v1095_v18 = vadd.f32 %v635_v15, %v580_v43 }
 0x330   : > { %v637_v19 = vpop.permute.xlu1 %636  ;;  %v686_v3 = vmax.f32 %v1085_v13, 0.0  ;;  %v679_v23 = vsub.f32 0.6931472, %v1088_v14 }
 0x331   : > { %v694_v20 = vsub.f32 0.0, %v690_v16  ;;  %v691_v21 = vand.u32 2147483647, %v1092_v17  ;;  %v1098_v26 = vadd.f32 %v637_v19, %v583_v48  ;;  %v1101_v27 = vmul.f32 -2.0, %v1095_v18 }
 0x332   : > { %947 = vtanh.f32 %v1095_v18  ;;  %v659_v60 = vpop.permute.xlu0 %658  ;;  %v687_v6 = vmax.f32 %v1092_v17, 0.0  ;;  %v680_v13 = vsub.f32 0.6931472, %v1095_v18 }
 0x333   : > { %v698_v28 = vmul.f32 1.442695, %v694_v20  ;;  %v695_v29 = vsub.f32 0.0, %v691_v21  ;;  %v1105_v30 = vmul.f32 -2.0, %v1098_v26  ;;  %v692_v31 = vand.u32 2147483647, %v1101_v27 }
 0x334   : > { %949 = vtanh.f32 %v1098_v26  ;;  %v670_v9 = vsub.f32 %v650_v57, %v659_v60  ;;  %v661_v22 = vpop.permute.xlu1 %660  ;;  %v688_v17 = vmax.f32 %v1101_v27, 0.0  ;;  %v681_v27 = vsub.f32 0.6931472, %v1098_v26 }
 0x335   : > { %951 = vpow2.f32 %v698_v28  ;;  %v700_v32 = vmul.f32 1.442695, %v695_v29  ;;  %v693_v33 = vand.u32 2147483647, %v1105_v30  ;;  %v696_v34 = vsub.f32 0.0, %v692_v31 }
 0x336   : > { %v689_v21 = vmax.f32 %v1105_v30, 0.0  ;;  %v671_v28 = vsub.f32 %v651_v61, %v661_v22 }
 0x337   : > { %v944_v35 = vpop.eup %943  ;;  %953 = vpow2.f32 %v700_v32  ;;  %v697_v36 = vsub.f32 0.0, %v693_v33  ;;  %v702_v37 = vmul.f32 1.442695, %v696_v34  ;;  %v663_v32 = vpop.permute.xlu0 %662 }
 0x338   : > { %775 = vst.msk [vmem:[%s1114_s16] sm:$0xff] %vm758_vm2, %v944_v35  ;;  %v672_v30 = vsub.f32 %v652_v62, %v663_v32 }
 0x339   : > { %v704_v38 = vmul.f32 1.442695, %v697_v36  ;;  %v946_v39 = vpop.eup %945  ;;  %955 = vpow2.f32 %v702_v37  ;;  %v879_v37 = vadd.f32 -0.9189385, %v670_v9 }
 0x33a   : > { %776 = vst.msk [vmem:[%s1114_s16 + $0x8] sm:$0xff] %vm758_vm2, %v946_v39  ;;  %v665_v39 = vpop.permute.xlu1 %664 }
 0x33b   : > { %957 = vpow2.f32 %v704_v38 }
 0x33c   : > { %v948_v40 = vpop.eup %947 }
 0x33d   : > { %777 = vst.msk [vmem:[%s1114_s16 + $0x10] sm:$0xff] %vm758_vm2, %v948_v40 }
 0x33e   : > { %v950_v41 = vpop.eup %949 }
 0x33f   : > { %v952_v42 = vpop.eup %951  ;;  %778 = vst.msk [vmem:[%s1114_s16 + $0x18] sm:$0xff] %vm758_vm2, %v950_v41 }
 0x340   : > { %v706_v43 = vadd.f32 1.0, %v952_v42  ;;  %v709_v48 = vmul.f32 -0.5, %v952_v42  ;;  %v712_v58 = vand.u32 2147483647, %v952_v42 }
 0x341   : > { %v954_v44 = vpop.eup %953 }
 0x342   : > { %959 = vlog2.f32 %v706_v43  ;;  %v715_v45 = vadd.f32 1.0, %v954_v44  ;;  %v718_v54 = vmul.f32 -0.5, %v954_v44  ;;  %v710_v56 = vadd.f32 1.0, %v709_v48 }
 0x343   : > { %v956_v46 = vpop.eup %955  ;;  %v721_v5 = vand.u32 2147483647, %v954_v44  ;;  %vm713_vm3 = vcmp.lt.f32.partialorder %v712_v58, 0.0004427343 }
 0x344   : > { %961 = vlog2.f32 %v715_v45  ;;  %v724_v49 = vadd.f32 1.0, %v956_v46  ;;  %v727_v59 = vmul.f32 -0.5, %v956_v46  ;;  %v719_v63 = vadd.f32 1.0, %v718_v54 }
 0x345   : > { %v1125_v47 = vpop.eup %957  ;;  %v711_v8 = vmul.f32 %v952_v42, %v710_v56  ;;  %v730_v12 = vand.u32 2147483647, %v956_v46  ;;  %vm722_vm4 = vcmp.lt.f32.partialorder %v721_v5, 0.0004427343  ;;  %v880_v45 = vadd.f32 -0.9189385, %v671_v28 }
 0x346   : > { %v733_v51 = vadd.f32 1.0, %v1125_v47  ;;  %963 = vlog2.f32 %v724_v49  ;;  %v736_v0 = vmul.f32 -0.5, %v1125_v47  ;;  %v728_v10 = vadd.f32 1.0, %v727_v59 }
 0x347   : > { %v720_v11 = vmul.f32 %v954_v44, %v719_v63  ;;  %v739_v14 = vand.u32 2147483647, %v1125_v47  ;;  %vm731_vm5 = vcmp.lt.f32.partialorder %v730_v12, 0.0004427343  ;;  %v881_v54 = vadd.f32 -0.9189385, %v672_v30 }
 0x348   : > { %965 = vlog2.f32 %v733_v51  ;;  %v737_v19 = vadd.f32 1.0, %v736_v0  ;;  %v729_v36 = vmul.f32 %v956_v46, %v728_v10  ;;  %v673_v46 = vsub.f32 %v653_v4, %v665_v39 }
 0x349   : > { %vm740_vm6 = vcmp.lt.f32.partialorder %v739_v14, 0.0004427343 }
 0x34a   : > { %v738_v38 = vmul.f32 %v1125_v47, %v737_v19  ;;  %v882_v57 = vadd.f32 -0.9189385, %v673_v46 }
 0x34c   : > { %v960_v1 = vpop.eup %959 }
 0x34d   : > { %v708_v7 = vmul.f32 0.6931472, %v960_v1 }
 0x34e   : > { %v962_v25 = vpop.eup %961 }
 0x34f   : > { %v714_v15 = vsel %vm713_vm3, %v711_v8, %v708_v7  ;;  %v717_v16 = vmul.f32 0.6931472, %v962_v25 }
 0x350   : > { %v742_v24 = vadd.f32 %v714_v15, %v686_v3  ;;  %v964_v20 = vpop.eup %963 }
 0x351   : > { %v723_v29 = vsel %vm722_vm4, %v720_v11, %v717_v16  ;;  %v726_v35 = vmul.f32 0.6931472, %v964_v20 }
 0x352   : > { %v966_v31 = vpop.eup %965  ;;  %v746_v33 = vsub.f32 %v678_v2, %v742_v24  ;;  %v743_v34 = vadd.f32 %v723_v29, %v687_v6 }
 0x353   : > { %v735_v18 = vmul.f32 0.6931472, %v966_v31  ;;  %v732_v42 = vsel %vm731_vm5, %v729_v36, %v726_v35 }
 0x354   : > { %v750_v40 = vmul.f32 2.0, %v746_v33  ;;  %v747_v41 = vsub.f32 %v679_v23, %v743_v34  ;;  %v744_v43 = vadd.f32 %v732_v42, %v688_v17 }
 0x355   : > { %v741_v44 = vsel %vm740_vm6, %v738_v38, %v735_v18 }
 0x356   : > { %v754_v48 = vsub.f32 %v879_v37, %v750_v40  ;;  %v751_v49 = vmul.f32 2.0, %v747_v41  ;;  %v745_v50 = vadd.f32 %v741_v44, %v689_v21  ;;  %v748_v51 = vsub.f32 %v680_v13, %v744_v43 }
 0x358   : > { %v759_v52 = vsel %vm758_vm2, %v754_v48, 0.0  ;;  %v755_v53 = vsub.f32 %v880_v45, %v751_v49  ;;  %v749_v47 = vsub.f32 %v681_v27, %v745_v50  ;;  %v752_v55 = vmul.f32 2.0, %v748_v51 }
 0x359   : > { %760 = vadd.xlane.f32.xlu0 %v759_v52 }
 0x35a   : > { %v762_v26 = vsel %vm758_vm2, %v755_v53, 0.0  ;;  %v753_v56 = vmul.f32 2.0, %v749_v47  ;;  %v756_v58 = vsub.f32 %v881_v54, %v752_v55 }
 0x35b   : > { %763 = vadd.xlane.f32.xlu1 %v762_v26 }
 0x35c   : > { %v765_v59 = vsel %vm758_vm2, %v756_v58, 0.0  ;;  %v757_v60 = vsub.f32 %v882_v57, %v753_v56 }
 0x35d   : > { %766 = vadd.xlane.f32.xlu0 %v765_v59 }
 0x35e   : > { %v768_v61 = vsel %vm758_vm2, %v757_v60, 0.0 }
 0x361   : > { %769 = vadd.xlane.f32.xlu0 %v768_v61 }
 0x3e6   : > { %v761_v62 = vpop.xlane.xlu0 %760 }
 0x3e7   : > { %780 = vst.msk [vmem:[%s1114_s16] sm:$0xff] %vm779_vm7, %v761_v62 }
 0x3e8   : > { %v764_v63 = vpop.xlane.xlu1 %763 }
 0x3e9   : > { %781 = vst.msk [vmem:[%s1114_s16 + $0x8] sm:$0xff] %vm779_vm7, %v764_v63 }
 0x3ea   : > { %v767_v0 = vpop.xlane.xlu0 %766 }
 0x3eb   : > { %782 = vst.msk [vmem:[%s1114_s16 + $0x10] sm:$0xff] %vm779_vm7, %v767_v0 }
 0x3ee   : > { %v770_v1 = vpop.xlane.xlu0 %769 }
 0x3ef   : > { %783 = vst.msk [vmem:[%s1114_s16 + $0x18] sm:$0xff] %vm779_vm7, %v770_v1 }
 0x3f0 PF: > { %s18_s27 = sadd.s32 1, %s973_s27  }
 0x3f1   : > { %p15_p4 = scmp.ge.s32.totalorder %s18_s27, 4  }
 0x3f3   :  { %17 = sbr.rel (!%p15_p4) target bundleno = 1 (0x1), region = 85 }

</bundles_post_ra>
